<compile_context>
chip_gen: v7x
topology: tpu7x:2x2x1
jax: 0.10.0
libtpu: 0.0.40
codegen_flags: <defaults>
</compile_context>

<pallas_src>
import functools
import math

import jax
import jax.numpy as jnp
from jax.experimental import pallas as pl
from jax.experimental.pallas import tpu as pltpu


def _conv_gelu_kernel(x_ref, w_ref, b_ref, o_ref, *,
                      Nb, Cin, Cin_pad, H, W, K, pad, mxu_dtype):
    """One grid step = Nb images, full spatial extent, no scratch.

    x_ref: (Nb, Cin, H*W)           flattened images (lane dim = H*W)
    w_ref: (Cout, K*K*Cin_pad)      weights, (kh, kw, ci)-ordered, zero-padded
    b_ref: (Cout, 1)                bias
    o_ref: (Nb, Cout, H*W)          flattened outputs (lane dim = H*W)
    """
    HW = H * W
    M = Nb * HW

    # Lay the Nb images side by side along the lane axis: (Cin, Nb*HW).
    if Nb == 1:
        x = x_ref[0].astype(jnp.float32)
    else:
        x = jnp.concatenate([x_ref[n] for n in range(Nb)], axis=1).astype(jnp.float32)

    # Pad channels once to a sublane multiple so every tap slab is 8-aligned;
    # the zero rows roll to zero and contract against zero weight columns.
    if Cin_pad > Cin:
        x = jnp.concatenate(
            [x, jnp.zeros((Cin_pad - Cin, M), jnp.float32)], axis=0)

    # Per-lane output-pixel coordinates within each image (shared across the
    # Nb images: the lane index modulo HW is the in-image pixel index).
    l_idx = jax.lax.broadcasted_iota(jnp.int32, (Cin_pad, M), 1)
    if HW & (HW - 1) == 0:  # power-of-two fast paths (bit ops on the VPU)
        m_idx = l_idx & (HW - 1)
    else:
        m_idx = l_idx % HW
    if W & (W - 1) == 0:
        wo_idx = m_idx & (W - 1)
        ho_idx = m_idx >> (W.bit_length() - 1)
    else:
        wo_idx = m_idx % W
        ho_idx = m_idx // W

    # Build the im2col operand in vregs: tap t=(kh,kw) is one lane roll of the
    # whole slab plus an iota validity mask (this IS the zero padding; lanes
    # that wrap across image boundaries are exactly the masked-invalid ones).
    pieces = []
    for kh in range(K):
        for kw in range(K):
            dh = kh - pad
            dw = kw - pad
            off = dh * W + dw                               # flat source offset
            piece = x if off == 0 else pltpu.roll(x, shift=(-off) % M, axis=1)
            conds = []
            if dh != 0:
                conds.append((ho_idx >= -dh) & (ho_idx < H - dh))
            if dw != 0:
                conds.append((wo_idx >= -dw) & (wo_idx < W - dw))
            if conds:
                valid = conds[0] if len(conds) == 1 else conds[0] & conds[1]
                piece = jnp.where(valid, piece, 0.0)
            pieces.append(piece)

    # (K*K*Cin_pad, Nb*HW); every concat boundary is a multiple of 8 sublanes.
    col = pieces[0] if len(pieces) == 1 else jnp.concatenate(pieces, axis=0)

    # Single deep MXU contraction: (Cout, K*K*Cin_pad) @ (K*K*Cin_pad, Nb*HW).
    acc = jax.lax.dot_general(
        w_ref[...].astype(mxu_dtype),
        col.astype(mxu_dtype),
        dimension_numbers=(((1,), (0,)), ((), ())),
        preferred_element_type=jnp.float32,
    )
    acc = acc + b_ref[...].astype(jnp.float32)              # (Cout, 1) broadcast
    # Exact (erf-based) GELU, matching torch.nn.GELU() default.
    inv_sqrt2 = jnp.float32(1.0 / math.sqrt(2.0))
    gelu = (0.5 * acc * (1.0 + jax.lax.erf(acc * inv_sqrt2))).astype(o_ref.dtype)

    if Nb == 1:
        o_ref[0] = gelu
    else:
        for n in range(Nb):
            o_ref[n] = gelu[:, n * HW:(n + 1) * HW]          # HW-aligned lane slices


def _pick_block_n(N, HW, col_rows, cin, cout):
    """Images per grid step.

    Fold the whole batch into one grid step (per-step fixed overhead ~0.35us
    dwarfs the matmul at small shapes).  Only split into exactly two
    'parallel' steps (v7x megacore) when each half still carries enough work,
    and never exceed a conservative per-step VMEM working-set budget.
    """
    budget = 20 << 20  # bytes; leaves headroom under v7x's 64 MiB VMEM

    def step_bytes(nb):
        # in-vreg/spilled im2col + double-buffered input & output blocks, f32
        return 4 * nb * HW * (col_rows + 2 * cin + 2 * cout)

    divisors = [d for d in range(N, 0, -1) if N % d == 0]
    nb = next((d for d in divisors if step_bytes(d) <= budget), 1)
    if nb == N and N % 2 == 0:
        half = N // 2
        if half * HW >= 4096 and step_bytes(half) <= budget:
            nb = half  # two balanced 'parallel' steps for the v7x megacore
    return nb


@functools.partial(jax.jit, static_argnames=("stride", "mxu_bf16"))
def basic_conv_forward(x_nchw, weight, bias, *, stride=1, mxu_bf16=False):
    """BasicConv forward (Conv2d + bias + exact GELU). NCHW in, NCHW out.

    mxu_bf16=True narrows only the two dot_general operands to bf16 (f32
    accumulation) — ~1e-3 deviation from the f32 torch reference, faster MXU
    path on v6e/v7x.  Default keeps exact f32 parity.
    """
    N, Cin, H, W = x_nchw.shape
    Cout, _, K, _ = weight.shape
    if K % 2 != 1:
        raise NotImplementedError("only odd kernel sizes are supported")
    pad = K // 2
    HW = H * W
    Cin_pad = ((Cin + 7) // 8) * 8
    col_rows = K * K * Cin_pad
    Nb = _pick_block_n(N, HW, col_rows, Cin, Cout)
    grid_steps = N // Nb

    # Free (metadata-only) view -- no transpose / pad passes over the image.
    x_flat = x_nchw.reshape(N, Cin, HW)
    # Tiny weight repack: contraction dim ordered (kh, kw, ci) with ci
    # zero-padded to Cin_pad, matching the kernel's im2col row order.
    w_t = jnp.transpose(weight, (0, 2, 3, 1))                 # (Cout, K, K, Cin)
    if Cin_pad > Cin:
        w_t = jnp.pad(w_t, ((0, 0), (0, 0), (0, 0), (0, Cin_pad - Cin)))
    w2 = w_t.reshape(Cout, col_rows)
    b2 = bias.reshape(Cout, 1)

    kernel = functools.partial(
        _conv_gelu_kernel, Nb=Nb, Cin=Cin, Cin_pad=Cin_pad, H=H, W=W, K=K,
        pad=pad, mxu_dtype=jnp.bfloat16 if mxu_bf16 else jnp.float32)

    out_flat = pl.pallas_call(
        kernel,
        out_shape=jax.ShapeDtypeStruct((N, Cout, HW), x_nchw.dtype),
        grid_spec=pltpu.PrefetchScalarGridSpec(
            num_scalar_prefetch=0,
            grid=(grid_steps,),
            in_specs=[
                pl.BlockSpec((Nb, Cin, HW), lambda n: (n, 0, 0)),
                # Constant block indices -> blocks stay resident across steps.
                pl.BlockSpec((Cout, col_rows), lambda n: (0, 0)),
                pl.BlockSpec((Cout, 1), lambda n: (0, 0)),
            ],
            out_specs=pl.BlockSpec((Nb, Cout, HW), lambda n: (n, 0, 0)),
        ),
        compiler_params=pltpu.CompilerParams(
            # 'parallel' only buys anything with >= 2 steps (v7x megacore);
            # with a single step it just adds pipeline priming.
            dimension_semantics=(
                ("parallel",) if grid_steps > 1 else ("arbitrary",)),
        ),
    )(x_flat, w2, b2)

    out = out_flat.reshape(N, Cout, H, W)          # free reshape back to NCHW
    if stride > 1:
        # Stride-s conv with "same" padding == subsampled stride-1 conv.
        # TODO(synk): compute only the strided output lanes inside the kernel.
        out = out[:, :, ::stride, ::stride]
    return out


def _reference(x_nchw, weight, bias, *, stride):
    pad = weight.shape[-1] // 2
    y = jax.lax.conv_general_dilated(
        x_nchw, weight,
        window_strides=(stride, stride),
        padding=((pad, pad), (pad, pad)),
        dimension_numbers=("NCHW", "OIHW", "NCHW"),
    )
    y = y + bias.reshape(1, -1, 1, 1)
    return jax.nn.gelu(y, approximate=False)


if __name__ == "__main__":
    # BasicConv(in_channel=4, out_channel=8, kernel_size=3, stride=1)
    N, Cin, H, W = 2, 4, 16, 16
    Cout, K, stride = 8, 3, 1

    key = jax.random.PRNGKey(0)
    kx, kw, kb = jax.random.split(key, 3)
    x = jax.random.normal(kx, (N, Cin, H, W), dtype=jnp.float32)

    # Deterministic parameter init (PyTorch-like uniform fan-in bound).
    fan_in = Cin * K * K
    bound = 1.0 / math.sqrt(fan_in)
    weight = jax.random.uniform(
        kw, (Cout, Cin, K, K), dtype=jnp.float32, minval=-bound, maxval=bound
    )
    bias = jax.random.uniform(
        kb, (Cout,), dtype=jnp.float32, minval=-bound, maxval=bound
    )

    out = basic_conv_forward(x, weight, bias, stride=stride)
    out = jax.block_until_ready(out)

    ref = _reference(x, weight, bias, stride=stride)
    assert out.shape == ref.shape == (N, Cout, H, W)
    assert jnp.allclose(out, ref, atol=1e-4, rtol=1e-4)

    print("KERNEL_OK")
</pallas_src>

<mosaic_0001>
module attributes {stable_mosaic.version = 11 : i64} {
  func.func @_conv_gelu_kernel(%arg0: i32, %arg1: memref<2x4x256xf32, #tpu.memory_space<vmem>>, %arg2: memref<8x72xf32, #tpu.memory_space<vmem>>, %arg3: memref<8x1xf32, #tpu.memory_space<vmem>>, %arg4: memref<2x8x256xf32, #tpu.memory_space<vmem>>) attributes {dimension_semantics = [#tpu.dimension_semantics<arbitrary>], iteration_bounds = array<i64: 1>, scalar_prefetch = 0 : i64, scratch_operands = 0 : i64, tpu.core_type = #tpu.core_type<tc>, window_params = [{transform_indices = @transform_0, window_bounds = array<i64: 2, 4, 256>}, {pipeline_mode = #tpu.pipeline_mode<synchronous>, transform_indices = @transform_1, window_bounds = array<i64: 8, 72>}, {pipeline_mode = #tpu.pipeline_mode<synchronous>, transform_indices = @transform_2, window_bounds = array<i64: 8, 1>}, {transform_indices = @transform_3, window_bounds = array<i64: 2, 8, 256>}]} {
    %c0 = arith.constant 0 : index
    %c0_0 = arith.constant 0 : index
    %c0_1 = arith.constant 0 : index
    %0 = vector.load %arg1[%c0, %c0_0, %c0_1] : memref<2x4x256xf32, #tpu.memory_space<vmem>>, vector<1x4x256xf32>
    %1 = vector.shape_cast %0 : vector<1x4x256xf32> to vector<4x256xf32>
    %c1 = arith.constant 1 : index
    %c0_2 = arith.constant 0 : index
    %c0_3 = arith.constant 0 : index
    %2 = vector.load %arg1[%c1, %c0_2, %c0_3] : memref<2x4x256xf32, #tpu.memory_space<vmem>>, vector<1x4x256xf32>
    %3 = vector.shape_cast %2 : vector<1x4x256xf32> to vector<4x256xf32>
    %4 = tpu.concatenate %1, %3 in 1 : vector<4x256xf32>, vector<4x256xf32> -> vector<4x512xf32>
    %cst = arith.constant 0.000000e+00 : f32
    %5 = vector.broadcast %cst : f32 to vector<4x512xf32>
    %6 = tpu.concatenate %4, %5 in 0 : vector<4x512xf32>, vector<4x512xf32> -> vector<8x512xf32>
    %7 = tpu.iota {dimensions = array<i32: 1>} : vector<8x512xi32>
    %c255_i32 = arith.constant 255 : i32
    %8 = vector.broadcast %c255_i32 : i32 to vector<8x512xi32>
    %9 = arith.andi %7, %8 : vector<8x512xi32>
    %c15_i32 = arith.constant 15 : i32
    %10 = vector.broadcast %c15_i32 : i32 to vector<8x512xi32>
    %11 = arith.andi %9, %10 : vector<8x512xi32>
    %c4_i32 = arith.constant 4 : i32
    %12 = vector.broadcast %c4_i32 : i32 to vector<8x512xi32>
    %13 = arith.shrsi %9, %12 : vector<8x512xi32>
    %c17_i32 = arith.constant 17 : i32
    %14 = tpu.dynamic_rotate %6 by %c17_i32 dim 1 : vector<8x512xf32>, i32 -> vector<8x512xf32>
    %c1_i32 = arith.constant 1 : i32
    %15 = vector.broadcast %c1_i32 : i32 to vector<8x512xi32>
    %16 = arith.cmpi sge, %13, %15 : vector<8x512xi32>
    %c17_i32_4 = arith.constant 17 : i32
    %17 = vector.broadcast %c17_i32_4 : i32 to vector<8x512xi32>
    %18 = arith.cmpi slt, %13, %17 : vector<8x512xi32>
    %19 = arith.andi %16, %18 : vector<8x512xi1>
    %c1_i32_5 = arith.constant 1 : i32
    %20 = vector.broadcast %c1_i32_5 : i32 to vector<8x512xi32>
    %21 = arith.cmpi sge, %11, %20 : vector<8x512xi32>
    %c17_i32_6 = arith.constant 17 : i32
    %22 = vector.broadcast %c17_i32_6 : i32 to vector<8x512xi32>
    %23 = arith.cmpi slt, %11, %22 : vector<8x512xi32>
    %24 = arith.andi %21, %23 : vector<8x512xi1>
    %25 = arith.andi %19, %24 : vector<8x512xi1>
    %cst_7 = arith.constant 0.000000e+00 : f32
    %26 = vector.broadcast %cst_7 : f32 to vector<8x512xf32>
    %27 = arith.select %25, %14, %26 : vector<8x512xi1>, vector<8x512xf32>
    %c16_i32 = arith.constant 16 : i32
    %28 = tpu.dynamic_rotate %6 by %c16_i32 dim 1 : vector<8x512xf32>, i32 -> vector<8x512xf32>
    %c1_i32_8 = arith.constant 1 : i32
    %29 = vector.broadcast %c1_i32_8 : i32 to vector<8x512xi32>
    %30 = arith.cmpi sge, %13, %29 : vector<8x512xi32>
    %c17_i32_9 = arith.constant 17 : i32
    %31 = vector.broadcast %c17_i32_9 : i32 to vector<8x512xi32>
    %32 = arith.cmpi slt, %13, %31 : vector<8x512xi32>
    %33 = arith.andi %30, %32 : vector<8x512xi1>
    %cst_10 = arith.constant 0.000000e+00 : f32
    %34 = vector.broadcast %cst_10 : f32 to vector<8x512xf32>
    %35 = arith.select %33, %28, %34 : vector<8x512xi1>, vector<8x512xf32>
    %c15_i32_11 = arith.constant 15 : i32
    %36 = tpu.dynamic_rotate %6 by %c15_i32_11 dim 1 : vector<8x512xf32>, i32 -> vector<8x512xf32>
    %c1_i32_12 = arith.constant 1 : i32
    %37 = vector.broadcast %c1_i32_12 : i32 to vector<8x512xi32>
    %38 = arith.cmpi sge, %13, %37 : vector<8x512xi32>
    %c17_i32_13 = arith.constant 17 : i32
    %39 = vector.broadcast %c17_i32_13 : i32 to vector<8x512xi32>
    %40 = arith.cmpi slt, %13, %39 : vector<8x512xi32>
    %41 = arith.andi %38, %40 : vector<8x512xi1>
    %c-1_i32 = arith.constant -1 : i32
    %42 = vector.broadcast %c-1_i32 : i32 to vector<8x512xi32>
    %43 = arith.cmpi sge, %11, %42 : vector<8x512xi32>
    %c15_i32_14 = arith.constant 15 : i32
    %44 = vector.broadcast %c15_i32_14 : i32 to vector<8x512xi32>
    %45 = arith.cmpi slt, %11, %44 : vector<8x512xi32>
    %46 = arith.andi %43, %45 : vector<8x512xi1>
    %47 = arith.andi %41, %46 : vector<8x512xi1>
    %cst_15 = arith.constant 0.000000e+00 : f32
    %48 = vector.broadcast %cst_15 : f32 to vector<8x512xf32>
    %49 = arith.select %47, %36, %48 : vector<8x512xi1>, vector<8x512xf32>
    %c1_i32_16 = arith.constant 1 : i32
    %50 = tpu.dynamic_rotate %6 by %c1_i32_16 dim 1 : vector<8x512xf32>, i32 -> vector<8x512xf32>
    %c1_i32_17 = arith.constant 1 : i32
    %51 = vector.broadcast %c1_i32_17 : i32 to vector<8x512xi32>
    %52 = arith.cmpi sge, %11, %51 : vector<8x512xi32>
    %c17_i32_18 = arith.constant 17 : i32
    %53 = vector.broadcast %c17_i32_18 : i32 to vector<8x512xi32>
    %54 = arith.cmpi slt, %11, %53 : vector<8x512xi32>
    %55 = arith.andi %52, %54 : vector<8x512xi1>
    %cst_19 = arith.constant 0.000000e+00 : f32
    %56 = vector.broadcast %cst_19 : f32 to vector<8x512xf32>
    %57 = arith.select %55, %50, %56 : vector<8x512xi1>, vector<8x512xf32>
    %c511_i32 = arith.constant 511 : i32
    %58 = tpu.dynamic_rotate %6 by %c511_i32 dim 1 : vector<8x512xf32>, i32 -> vector<8x512xf32>
    %c-1_i32_20 = arith.constant -1 : i32
    %59 = vector.broadcast %c-1_i32_20 : i32 to vector<8x512xi32>
    %60 = arith.cmpi sge, %11, %59 : vector<8x512xi32>
    %c15_i32_21 = arith.constant 15 : i32
    %61 = vector.broadcast %c15_i32_21 : i32 to vector<8x512xi32>
    %62 = arith.cmpi slt, %11, %61 : vector<8x512xi32>
    %63 = arith.andi %60, %62 : vector<8x512xi1>
    %cst_22 = arith.constant 0.000000e+00 : f32
    %64 = vector.broadcast %cst_22 : f32 to vector<8x512xf32>
    %65 = arith.select %63, %58, %64 : vector<8x512xi1>, vector<8x512xf32>
    %c497_i32 = arith.constant 497 : i32
    %66 = tpu.dynamic_rotate %6 by %c497_i32 dim 1 : vector<8x512xf32>, i32 -> vector<8x512xf32>
    %c-1_i32_23 = arith.constant -1 : i32
    %67 = vector.broadcast %c-1_i32_23 : i32 to vector<8x512xi32>
    %68 = arith.cmpi sge, %13, %67 : vector<8x512xi32>
    %c15_i32_24 = arith.constant 15 : i32
    %69 = vector.broadcast %c15_i32_24 : i32 to vector<8x512xi32>
    %70 = arith.cmpi slt, %13, %69 : vector<8x512xi32>
    %71 = arith.andi %68, %70 : vector<8x512xi1>
    %c1_i32_25 = arith.constant 1 : i32
    %72 = vector.broadcast %c1_i32_25 : i32 to vector<8x512xi32>
    %73 = arith.cmpi sge, %11, %72 : vector<8x512xi32>
    %c17_i32_26 = arith.constant 17 : i32
    %74 = vector.broadcast %c17_i32_26 : i32 to vector<8x512xi32>
    %75 = arith.cmpi slt, %11, %74 : vector<8x512xi32>
    %76 = arith.andi %73, %75 : vector<8x512xi1>
    %77 = arith.andi %71, %76 : vector<8x512xi1>
    %cst_27 = arith.constant 0.000000e+00 : f32
    %78 = vector.broadcast %cst_27 : f32 to vector<8x512xf32>
    %79 = arith.select %77, %66, %78 : vector<8x512xi1>, vector<8x512xf32>
    %c496_i32 = arith.constant 496 : i32
    %80 = tpu.dynamic_rotate %6 by %c496_i32 dim 1 : vector<8x512xf32>, i32 -> vector<8x512xf32>
    %c-1_i32_28 = arith.constant -1 : i32
    %81 = vector.broadcast %c-1_i32_28 : i32 to vector<8x512xi32>
    %82 = arith.cmpi sge, %13, %81 : vector<8x512xi32>
    %c15_i32_29 = arith.constant 15 : i32
    %83 = vector.broadcast %c15_i32_29 : i32 to vector<8x512xi32>
    %84 = arith.cmpi slt, %13, %83 : vector<8x512xi32>
    %85 = arith.andi %82, %84 : vector<8x512xi1>
    %cst_30 = arith.constant 0.000000e+00 : f32
    %86 = vector.broadcast %cst_30 : f32 to vector<8x512xf32>
    %87 = arith.select %85, %80, %86 : vector<8x512xi1>, vector<8x512xf32>
    %c495_i32 = arith.constant 495 : i32
    %88 = tpu.dynamic_rotate %6 by %c495_i32 dim 1 : vector<8x512xf32>, i32 -> vector<8x512xf32>
    %c-1_i32_31 = arith.constant -1 : i32
    %89 = vector.broadcast %c-1_i32_31 : i32 to vector<8x512xi32>
    %90 = arith.cmpi sge, %13, %89 : vector<8x512xi32>
    %c15_i32_32 = arith.constant 15 : i32
    %91 = vector.broadcast %c15_i32_32 : i32 to vector<8x512xi32>
    %92 = arith.cmpi slt, %13, %91 : vector<8x512xi32>
    %93 = arith.andi %90, %92 : vector<8x512xi1>
    %c-1_i32_33 = arith.constant -1 : i32
    %94 = vector.broadcast %c-1_i32_33 : i32 to vector<8x512xi32>
    %95 = arith.cmpi sge, %11, %94 : vector<8x512xi32>
    %c15_i32_34 = arith.constant 15 : i32
    %96 = vector.broadcast %c15_i32_34 : i32 to vector<8x512xi32>
    %97 = arith.cmpi slt, %11, %96 : vector<8x512xi32>
    %98 = arith.andi %95, %97 : vector<8x512xi1>
    %99 = arith.andi %93, %98 : vector<8x512xi1>
    %cst_35 = arith.constant 0.000000e+00 : f32
    %100 = vector.broadcast %cst_35 : f32 to vector<8x512xf32>
    %101 = arith.select %99, %88, %100 : vector<8x512xi1>, vector<8x512xf32>
    %102 = tpu.concatenate %27, %35, %49, %57, %6, %65, %79, %87, %101 in 0 : vector<8x512xf32>, vector<8x512xf32>, vector<8x512xf32>, vector<8x512xf32>, vector<8x512xf32>, vector<8x512xf32>, vector<8x512xf32>, vector<8x512xf32>, vector<8x512xf32> -> vector<72x512xf32>
    %c0_36 = arith.constant 0 : index
    %c0_37 = arith.constant 0 : index
    %103 = vector.load %arg2[%c0_36, %c0_37] : memref<8x72xf32, #tpu.memory_space<vmem>>, vector<8x72xf32>
    %cst_38 = arith.constant dense<0.000000e+00> : vector<8x512xf32>
    %104 = tpu.matmul %103, %102, %cst_38 {dimension_numbers = #tpu.dot_dimension_numbers<[1], [0], [0], [1], [0, 0, 1, 1], [], []>} : vector<8x72xf32>, vector<72x512xf32>, vector<8x512xf32> -> vector<8x512xf32>
    %c0_39 = arith.constant 0 : index
    %c0_40 = arith.constant 0 : index
    %105 = vector.load %arg3[%c0_39, %c0_40] : memref<8x1xf32, #tpu.memory_space<vmem>>, vector<8x1xf32>
    %106 = vector.broadcast %105 : vector<8x1xf32> to vector<8x512xf32>
    %107 = arith.addf %104, %106 : vector<8x512xf32>
    %cst_41 = arith.constant 5.000000e-01 : f32
    %108 = vector.broadcast %cst_41 : f32 to vector<8x512xf32>
    %109 = arith.mulf %108, %107 : vector<8x512xf32>
    %cst_42 = arith.constant 0.707106769 : f32
    %110 = vector.broadcast %cst_42 : f32 to vector<8x512xf32>
    %111 = arith.mulf %107, %110 : vector<8x512xf32>
    %112 = math.erf %111 : vector<8x512xf32>
    %cst_43 = arith.constant 1.000000e+00 : f32
    %113 = vector.broadcast %cst_43 : f32 to vector<8x512xf32>
    %114 = arith.addf %113, %112 : vector<8x512xf32>
    %115 = arith.mulf %109, %114 : vector<8x512xf32>
    %116 = vector.extract_strided_slice %115 {offsets = [0, 0], sizes = [8, 256], strides = [1, 1]} : vector<8x512xf32> to vector<8x256xf32>
    %c0_44 = arith.constant 0 : index
    %c0_45 = arith.constant 0 : index
    %c0_46 = arith.constant 0 : index
    %117 = vector.load %arg4[%c0_44, %c0_45, %c0_46] : memref<2x8x256xf32, #tpu.memory_space<vmem>>, vector<1x8x256xf32>
    %118 = vector.shape_cast %117 : vector<1x8x256xf32> to vector<8x256xf32>
    %119 = vector.shape_cast %116 : vector<8x256xf32> to vector<1x8x256xf32>
    tpu.vector_store %arg4[%c0_44, %c0_45, %c0_46], %119 {strides = array<i32>} : memref<2x8x256xf32, #tpu.memory_space<vmem>>, vector<1x8x256xf32>,
    %120 = vector.extract_strided_slice %115 {offsets = [0, 256], sizes = [8, 256], strides = [1, 1]} : vector<8x512xf32> to vector<8x256xf32>
    %c1_47 = arith.constant 1 : index
    %c0_48 = arith.constant 0 : index
    %c0_49 = arith.constant 0 : index
    %121 = vector.load %arg4[%c1_47, %c0_48, %c0_49] : memref<2x8x256xf32, #tpu.memory_space<vmem>>, vector<1x8x256xf32>
    %122 = vector.shape_cast %121 : vector<1x8x256xf32> to vector<8x256xf32>
    %123 = vector.shape_cast %120 : vector<8x256xf32> to vector<1x8x256xf32>
    tpu.vector_store %arg4[%c1_47, %c0_48, %c0_49], %123 {strides = array<i32>} : memref<2x8x256xf32, #tpu.memory_space<vmem>>, vector<1x8x256xf32>,
    return
  }
  func.func @transform_0(%arg0: i32) -> (i32, i32, i32) {
    %c0_i32 = arith.constant 0 : i32
    %c0_i32_0 = arith.constant 0 : i32
    %c0_i32_1 = arith.constant 0 : i32
    return %arg0, %c0_i32, %c0_i32_0 : i32, i32, i32
  }
  func.func @transform_1(%arg0: i32) -> (i32, i32) {
    %c0_i32 = arith.constant 0 : i32
    %c0_i32_0 = arith.constant 0 : i32
    %c0_i32_1 = arith.constant 0 : i32
    return %c0_i32, %c0_i32_0 : i32, i32
  }
  func.func @transform_2(%arg0: i32) -> (i32, i32) {
    %c0_i32 = arith.constant 0 : i32
    %c0_i32_0 = arith.constant 0 : i32
    %c0_i32_1 = arith.constant 0 : i32
    return %c0_i32, %c0_i32_0 : i32, i32
  }
  func.func @transform_3(%arg0: i32) -> (i32, i32, i32) {
    %c0_i32 = arith.constant 0 : i32
    %c0_i32_0 = arith.constant 0 : i32
    %c0_i32_1 = arith.constant 0 : i32
    return %arg0, %c0_i32, %c0_i32_0 : i32, i32, i32
  }
}

</mosaic_0001>

<bundles_post_ra>
// kernel: basic_conv_forward.1
= control target key start
LH: loop header
LB: loop body
LE: loop exit
PB: predicated region body
PF: predicated region fallthrough
CT: control target
= control target key end

     0   :  { %vm1098_vm0 = vcmask 1043456   ;;  %s608_s16 = smov 17   ;;  %s609_s17 = smov 15   ;;  %v613_v10 = vmov 0.0   ;;  %v614_v11 = vmov 0   ;;  %v28_v13 = vlaneseq  ;;  %s1094_s0 = inlined_call_operand.vmem [shape: f32[2,4,256], index: 0, kind: input, shape index: {}]   ;;  %s1095_s2 = inlined_call_operand.vmem [shape: f32[8,1], index: 2, kind: input, shape index: {}]   ;;  %s1096_s1 = inlined_call_operand.vmem [shape: f32[8,72], index: 1, kind: input, shape index: {}]   ;;  %s1097_s3 = inlined_call_operand.vmem [shape: f32[2,8,256], index: 3, kind: output, shape index: {}]  }
   0x1   :  { %v640_v0 = vld [vmem:[%s1094_s0] sm:$0xff]  ;;  %v645_v1 = vld [vmem:[%s1094_s0 + $0x8] sm:$0xff]  ;;  %s607_s0 = smov 16   ;;  %s610_s18 = smov 1   ;;  %320 = vmatprep.mubr.f32.mxu0 %v613_v10  ;;  %391 = vmatprep.mubr.f32.mxu1 %v613_v10 }
   0x2   :  { %v649_v2 = vcombine.high %v640_v0, %v640_v0  ;;  %v24_v3 = vsel %vm1098_vm0, %v640_v0, 0.0  ;;  %v655_v4 = vcombine.high %v645_v1, %v645_v1  ;;  %v26_v6 = vsel %vm1098_vm0, %v645_v1, 0.0  ;;  %s611_s19 = smov 127   ;;  %s612_s20 = smov 113   ;;  %596 = vset.pattern.permute.xlu0 %v614_v11  ;;  %v246_v12 = vld [vmem:[%s1095_s2] sm:$0xff] }
   0x3   :  { %s615_s21 = smov 112   ;;  %s616_s22 = smov 111   ;;  %v666_v14 = vand.u32 127, %v28_v13 }
   0x4   :  { %v25_v5 = vsel %vm1098_vm0, %v649_v2, 0.0  ;;  %v27_v7 = vsel %vm1098_vm0, %v655_v4, 0.0 }
   0x5   :  { %v536_v8 = vpack.i.bf16 %v25_v5, %v24_v3  ;;  %v541_v9 = vpack.i.bf16 %v27_v7, %v26_v6  ;;  %v30_v15 = vadd.s32 128, %v666_v14  ;;  %v33_v18 = vand.u32 255, %v666_v14 }
   0x6   :  { %v32_v19 = vadd.s32 384, %v666_v14  ;;  %v31_v20 = vadd.s32 256, %v666_v14 }
   0x7   :  { %537 = vrot.lane.b32.xlu1 %v536_v8, %s607_s0  ;;  %527 = vrot.lane.b32.xlu0 %v536_v8, %s608_s16  ;;  %v34_v16 = vand.u32 255, %v30_v15  ;;  %v678_v22 = vshra.s32 %v33_v18, 4  ;;  %v685_v26 = vand.u32 15, %v33_v18 }
   0x8   :  { %v36_v23 = vand.u32 255, %v32_v19  ;;  %v35_v24 = vand.u32 255, %v31_v20 }
   0x9   :  { %v669_v17 = vshra.s32 %v34_v16, 4  ;;  %v674_v21 = vand.u32 15, %v34_v16  ;;  %vm58_vm5 = vcmp.ge.s32.totalorder %v678_v22, 1  ;;  %vm62_vm6 = vcmp.lt.s32.totalorder %v678_v22, 17 }
   0xa   :  { %v689_v27 = vshra.s32 %v36_v23, 4  ;;  %v691_v28 = vshra.s32 %v35_v24, 4  ;;  %vm701_vm8 = vmand %vm58_vm5, %vm62_vm6  ;;  %vm1099_vm9 = vcmp.ge.s32.totalorder %v685_v26, 1  ;;  %v706_v31 = vand.u32 15, %v36_v23 }
   0xb   :  { %542 = vrot.lane.b32.xlu1 %v541_v9, %s607_s0  ;;  %532 = vrot.lane.b32.xlu0 %v541_v9, %s608_s16  ;;  %vm59_vm1 = vcmp.ge.s32.totalorder %v669_v17, 1  ;;  %vm63_vm2 = vcmp.lt.s32.totalorder %v669_v17, 17  ;;  %vm1100_vm4 = vcmp.ge.s32.totalorder %v674_v21, 1  ;;  %v710_v32 = vand.u32 15, %v35_v24  ;;  %vm722_vm15 = vmand %vm701_vm8, %vm1099_vm9 }
   0xc   :  { %vm680_vm3 = vmand %vm59_vm1, %vm63_vm2  ;;  %vm61_vm10 = vcmp.ge.s32.totalorder %v689_v27, 1  ;;  %vm65_vm11 = vcmp.lt.s32.totalorder %v689_v27, 17  ;;  %vm60_vm13 = vcmp.ge.s32.totalorder %v691_v28, 1  ;;  %vm64_vm14 = vcmp.lt.s32.totalorder %v691_v28, 17 }
   0xd   :  { %vm697_vm7 = vmand %vm680_vm3, %vm1100_vm4  ;;  %vm1101_vm2 = vcmp.ge.s32.totalorder %v706_v31, 1  ;;  %vm53_vm5 = vcmp.lt.s32.totalorder %v666_v14, 17  ;;  %vm98_vm6 = vcmp.lt.s32.totalorder %v666_v14, 16  ;;  %vm1102_vm9 = vcmp.ge.s32.totalorder %v710_v32, 1 }
   0xe   :  { %vm469_vm12 = vmpackc.low %vm680_vm3, %vm697_vm7  ;;  %vm1103_vm4 = vcmp.lt.s32.totalorder %v674_v21, 15 }
   0xf   :  { %552 = vrot.lane.b32.xlu1 %v541_v9, %s609_s17  ;;  %547 = vrot.lane.b32.xlu0 %v536_v8, %s609_s17  ;;  %vm726_vm1 = vmand %vm61_vm10, %vm65_vm11  ;;  %vm1105_vm10 = vcmp.lt.s32.totalorder %v710_v32, 15 }
  0x10   :  { %vm733_vm0 = vmand %vm60_vm13, %vm64_vm14 }
  0x11   :  { %vm747_vm11 = vmand %vm726_vm1, %vm1101_vm2  ;;  %vm1104_vm2 = vcmp.lt.s32.totalorder %v706_v31, 15 }
  0x12   :  { %vm759_vm13 = vmand %vm733_vm0, %vm1102_vm9 }
  0x13   :  { %562 = vrot.lane.b32.xlu1 %v541_v9, %s610_s18  ;;  %557 = vrot.lane.b32.xlu0 %v536_v8, %s610_s18  ;;  %vm767_vm14 = vmand %vm680_vm3, %vm1103_vm4  ;;  %vm1124_vm3 = vcmp.ge.s32.totalorder %v674_v21, 1  ;;  %vm115_vm4 = vcmp.lt.s32.totalorder %v666_v14, 15 }
  0x14   :  { %vm493_vm9 = vmpackc.low %vm726_vm1, %vm747_vm11  ;;  %vm193_vm11 = vcmp.lt.s32.totalorder %v691_v28, 15 }
  0x15   :  { %vm799_vm7 = vmpackc.low %vm1124_vm3, %vm767_vm14  ;;  %vm1129_vm14 = vcmp.lt.s32.totalorder %v685_v26, 15 }
  0x16   :  { %vm132_vm3 = vmand %vm701_vm8, %vm1129_vm14  ;;  %vm1133_vm14 = vcmp.ge.s32.totalorder %v706_v31, 1 }
  0x17   :  { %572 = vrot.lane.b32.xlu1 %v541_v9, %s611_s19  ;;  %567 = vrot.lane.b32.xlu0 %v536_v8, %s611_s19 }
  0x1b   :  { %582 = vrot.lane.b32.xlu1 %v541_v9, %s612_s20  ;;  %577 = vrot.lane.b32.xlu0 %v536_v8, %s612_s20 }
  0x1f   :  { %592 = vrot.lane.b32.xlu1 %v541_v9, %s615_s21  ;;  %587 = vrot.lane.b32.xlu0 %v536_v8, %s615_s21 }
  0x23   :  { %226 = vrot.lane.b32.xlu1 %v25_v5, %s616_s22  ;;  %224 = vrot.lane.b32.xlu0 %v24_v3, %s616_s22 }
  0x27   :  { %230 = vrot.lane.b32.xlu1 %v27_v7, %s616_s22  ;;  %228 = vrot.lane.b32.xlu0 %v26_v6, %s616_s22 }
  0x2b   :  { %249 = vperm.xlu0 %596, %v246_v12  }
  0x79   :  { %v538_v35 = vpop.permute.xlu1 %537  ;;  %v528_v36 = vpop.permute.xlu0 %527 }
  0x7a   :  { %v540_v38 = vunpack.i.h.bf16 %v538_v35  ;;  %v539_v39 = vunpack.i.l.bf16 %v538_v35  ;;  %v530_v40 = vunpack.i.h.bf16 %v528_v36  ;;  %v529_v41 = vunpack.i.l.bf16 %v528_v36 }
  0x7c   :  { %v56_v43 = vsel %vm53_vm5, %v529_v41, %v530_v40  ;;  %v101_v44 = vsel %vm98_vm6, %v539_v39, %v540_v38 }
  0x7d   :  { %v543_v46 = vpop.permute.xlu1 %542  ;;  %v533_v47 = vpop.permute.xlu0 %532  ;;  %v468_v48 = vpack.c.bf16 %v101_v44, %v56_v43 }
  0x7e   :  { %v545_v50 = vunpack.i.h.bf16 %v543_v46  ;;  %v544_v51 = vunpack.i.l.bf16 %v543_v46  ;;  %v535_v52 = vunpack.i.h.bf16 %v533_v47  ;;  %v534_v53 = vunpack.i.l.bf16 %v533_v47 }
  0x7f   :  { %470 = vmatprep.subr.msk.bf16.mxu0 %vm469_vm12, %v468_v48  ;;  %vm807_vm12 = vmand %vm726_vm1, %vm1104_vm2  ;;  %vm148_vm1 = vcmp.lt.s32.totalorder %v666_v14, 1 }
  0x80   :  { %v57_v54 = vsel %vm53_vm5, %v535_v52, %v529_v41  ;;  %v102_v55 = vsel %vm98_vm6, %v545_v50, %v539_v39  ;;  %v54_v56 = vsel %vm53_vm5, %v534_v53, %v535_v52  ;;  %v99_v57 = vsel %vm98_vm6, %v544_v51, %v545_v50  ;;  %vm823_vm2 = vmand %vm733_vm0, %vm1105_vm10 }
  0x81   :  { %v553_v60 = vpop.permute.xlu1 %552  ;;  %v548_v61 = vpop.permute.xlu0 %547  ;;  %v471_v62 = vpack.c.bf16 %v102_v55, %v57_v54  ;;  %v492_v63 = vpack.c.bf16 %v99_v57, %v54_v56  ;;  %v55_v3 = vsel %vm53_vm5, %v530_v40, %v534_v53  ;;  %v100_v5 = vsel %vm98_vm6, %v540_v38, %v544_v51  ;;  %vm1132_vm6 = vmpackc.low %vm701_vm8, %vm722_vm15 }
  0x82   :  { %v555_v6 = vunpack.i.h.bf16 %v553_v60  ;;  %vm192_vm5 = vcmp.lt.s32.totalorder %v669_v17, 15  ;;  %v554_v8 = vunpack.i.l.bf16 %v553_v60  ;;  %v550_v9 = vunpack.i.h.bf16 %v548_v61  ;;  %vm843_vm10 = vmpackc.low %vm1133_vm14, %vm807_vm12 }
  0x83   :  { %v549_v10 = vunpack.i.l.bf16 %v548_v61  ;;  %473 = vmatpush1.bf16.msk.msra.mxu0 %vm1132_vm6, %v471_v62  ;;  %494 = vmatprep.subr.msk.bf16.mxu1 %vm493_vm9, %v492_v63  ;;  %v495_v11 = vpack.c.bf16 %v100_v5, %v55_v3  ;;  %vm1136_vm8 = vcmp.ge.s32.totalorder %v685_v26, 1  ;;  %vm1139_vm9 = vmpackc.low %vm733_vm0, %vm759_vm13  ;;  %vm1140_vm12 = vcmp.ge.s32.totalorder %v710_v32, 1 }
  0x84   :  { %vm850_vm15 = vmpackc.low %vm1136_vm8, %vm132_vm3  ;;  %vm1143_vm0 = vcmp.ge.s32.totalorder %v669_v17, 4294967295  ;;  %v116_v29 = vsel %vm115_vm4, %v554_v8, %v555_v6  ;;  %v117_v30 = vsel %vm115_vm4, %v550_v9, %v554_v8  ;;  %vm1147_vm8 = vcmp.lt.s32.totalorder %v674_v21, 15 }
  0x85   :  { %497 = vmatpush1.bf16.msk.msra.mxu1 %vm1139_vm9, %v495_v11  ;;  %v563_v15 = vpop.permute.xlu1 %562  ;;  %v558_v16 = vpop.permute.xlu0 %557  ;;  %vm865_vm3 = vmpackc.low %vm1140_vm12, %vm823_vm2  ;;  %v118_v33 = vsel %vm115_vm4, %v549_v10, %v550_v9  ;;  %v119_v34 = vsel %vm115_vm4, %v555_v6, %v549_v10  ;;  %vm1146_vm2 = vcmask 1043456   ;;  %v1159_v51 = vmov 0 }
  0x86   :  { %v565_v19 = vunpack.i.h.bf16 %v563_v15  ;;  %v564_v20 = vunpack.i.l.bf16 %v563_v15  ;;  %v560_v23 = vunpack.i.h.bf16 %v558_v16  ;;  %v559_v24 = vunpack.i.l.bf16 %v558_v16  ;;  %vm875_vm13 = vmand %vm1143_vm0, %vm192_vm5 }
  0x87   :  { %vm890_vm9 = vmpackc.low %vm1147_vm8, %vm1146_vm2  ;;  %vm1151_vm5 = vcmp.lt.s32.totalorder %v706_v31, 15  ;;  %vm1154_vm0 = vcmp.ge.s32.totalorder %v674_v21, 1  ;;  %vm1158_vm8 = vcmp.lt.s32.totalorder %v685_v26, 15  ;;  %vm187_vm14 = vcmp.ge.s32.totalorder %v678_v22, 4294967295 }
  0x88   :  { %v149_v35 = vsel %vm148_vm1, %v564_v20, %v565_v19  ;;  %v150_v36 = vsel %vm148_vm1, %v560_v23, %v564_v20  ;;  %v151_v37 = vsel %vm148_vm1, %v559_v24, %v560_v23  ;;  %v152_v38 = vsel %vm148_vm1, %v565_v19, %v559_v24  ;;  %vm1150_vm4 = vmmov %vm1146_vm2 }
  0x89   :  { %vm905_vm12 = vmpackc.low %vm1151_vm5, %vm1150_vm4  ;;  %v498_v40 = vpack.c.bf16 %v149_v35, %v116_v29  ;;  %v474_v41 = vpack.c.bf16 %v151_v37, %v118_v33  ;;  %v477_v42 = vpack.c.bf16 %v152_v38, %v119_v34  ;;  %v501_v43 = vpack.c.bf16 %v150_v36, %v117_v30  ;;  %v573_v44 = vpop.permute.xlu1 %572  ;;  %v568_v45 = vpop.permute.xlu0 %567 }
  0x8a   :  { %vm913_vm2 = vmand %vm875_vm13, %vm1154_vm0  ;;  %v575_v47 = vunpack.i.h.bf16 %v573_v44  ;;  %v574_v48 = vunpack.i.l.bf16 %v573_v44  ;;  %v570_v49 = vunpack.i.h.bf16 %v568_v45  ;;  %v569_v50 = vunpack.i.l.bf16 %v568_v45 }
  0x8b   :  { %vm1157_vm1 = vmmov %vm1150_vm4  ;;  %476 = vmatprep.subr.msk.bf16.mxu0 %vm799_vm7, %v474_v41  ;;  %500 = vmatprep.subr.msk.bf16.mxu1 %vm843_vm10, %v498_v40  ;;  %vm1162_vm0 = vcmp.lt.s32.totalorder %v710_v32, 15  ;;  %vm1165_vm7 = vcmp.lt.s32.totalorder %v666_v14, 127 }
  0x8c   :  { %vm920_vm4 = vmpackc.low %vm1158_vm8, %vm1157_vm1  ;;  %vm189_vm8 = vcmp.ge.s32.totalorder %v691_v28, 4294967295  ;;  %v166_v53 = vsel %vm1165_vm7, %v574_v48, %v575_v47  ;;  %479 = vmatpush1.bf16.msk.msra.mxu0 %vm850_vm15, %v477_v42  ;;  %503 = vmatpush1.bf16.msk.msra.mxu1 %vm865_vm3, %v501_v43  ;;  %vm1169_vm15 = vcmp.lt.s32.totalorder %v689_v27, 15 }
  0x8d   :  { %v1160_v51 = vsel %vm920_vm4, 4294967295, %v1159_v51  ;;  %vm1161_vm5 = vmmov %vm1157_vm1  ;;  %vm191_vm1 = vcmp.lt.s32.totalorder %v678_v22, 15  ;;  %v507_v57 = vpack.c.bf16 %v166_v53, %v645_v1  ;;  %v583_v61 = vpop.permute.xlu1 %582  ;;  %v578_v62 = vpop.permute.xlu0 %577 }
  0x8e   :  { %vm931_vm6 = vmpackc.low %vm1162_vm0, %vm1161_vm5  ;;  %v585_v1 = vunpack.i.h.bf16 %v583_v61  ;;  %v579_v3 = vunpack.i.l.bf16 %v578_v62 }
  0x8f   :  { %vm1166_vm10 = vmmov %vm1165_vm7 }
  0x90   :  { %v167_v54 = vsel %vm1166_vm10, %v570_v49, %v574_v48  ;;  %vm1167_vm4 = vmmov %vm1165_vm7 }
  0x91   :  { %v168_v55 = vsel %vm1167_vm4, %v569_v50, %v570_v49  ;;  %vm1168_vm5 = vmmov %vm1167_vm4  ;;  %v480_v58 = vpack.c.bf16 %v167_v54, %v649_v2  ;;  %vm1170_vm4 = vcmp.ge.s32.totalorder %v689_v27, 4294967295  ;;  %v584_v2 = vunpack.i.l.bf16 %v583_v61  ;;  %v593_v28 = vpop.permute.xlu1 %592  ;;  %v588_v5 = vpop.permute.xlu0 %587 }
  0x92   :  { %v169_v56 = vsel %vm1168_vm5, %v575_v47, %v569_v50  ;;  %vm487_vm0 = vmpackc.low %vm875_vm13, %vm913_vm2  ;;  %v483_v59 = vpack.c.bf16 %v168_v55, %v640_v0  ;;  %vm1178_vm5 = vcmp.ge.s32.totalorder %v706_v31, 1  ;;  %v595_v7 = vunpack.i.h.bf16 %v593_v28 }
  0x93   :  { %v504_v60 = vpack.c.bf16 %v169_v56, %v655_v4  ;;  %vm963_vm7 = vmand %vm1170_vm4, %vm1169_vm15  ;;  %v580_v4 = vunpack.i.h.bf16 %v578_v62  ;;  %482 = vmatprep.subr.msk.bf16.mxu0 %vm890_vm9, %v480_v58  ;;  %v594_v8 = vunpack.i.l.bf16 %v593_v28  ;;  %v590_v9 = vunpack.i.h.bf16 %v588_v5 }
  0x94   :  { %vm971_vm10 = vmand %vm187_vm14, %vm191_vm1  ;;  %vm182_vm14 = vcmp.lt.s32.totalorder %v666_v14, 113  ;;  %vm1177_vm1 = vnez %v1160_v51  ;;  %v589_v10 = vunpack.i.l.bf16 %v588_v5  ;;  %vm1184_vm15 = vcmp.ge.s32.totalorder %v710_v32, 1 }
  0x95   :  { %506 = vmatprep.subr.msk.bf16.mxu1 %vm905_vm12, %v504_v60  ;;  %vm983_vm3 = vmand %vm189_vm8, %vm193_vm11  ;;  %485 = vmatpush1.bf16.msk.msra.mxu0 %vm1177_vm1, %v483_v59  ;;  %vm215_vm11 = vcmp.lt.s32.totalorder %v666_v14, 112  ;;  %vm1181_vm12 = vcmp.ge.s32.totalorder %v685_v26, 1  ;;  %v183_v12 = vsel %vm182_vm14, %v584_v2, %v585_v1  ;;  %v184_v13 = vsel %vm182_vm14, %v580_v4, %v584_v2  ;;  %v227_v34 = vpop.permute.xlu1 %226  ;;  %v225_v17 = vpop.permute.xlu0 %224 }
  0x96   :  { %vm994_vm9 = vmand %vm963_vm7, %vm1178_vm5  ;;  %509 = vmatpush1.bf16.msk.msra.mxu1 %vm931_vm6, %v507_v57  ;;  %v185_v15 = vsel %vm182_vm14, %v579_v3, %v580_v4  ;;  %v186_v16 = vsel %vm182_vm14, %v585_v1, %v579_v3  ;;  %v216_v18 = vsel %vm215_vm11, %v594_v8, %v595_v7  ;;  %v217_v19 = vsel %vm215_vm11, %v590_v9, %v594_v8 }
  0x97   :  { %vm1005_vm8 = vmand %vm971_vm10, %vm1181_vm12  ;;  %v218_v20 = vsel %vm215_vm11, %v589_v10, %v590_v9  ;;  %v219_v23 = vsel %vm215_vm11, %v595_v7, %v589_v10  ;;  %v513_v24 = vpack.c.bf16 %v216_v18, %v183_v12  ;;  %v486_v29 = vpack.c.bf16 %v217_v19, %v184_v13 }
  0x98   :  { %vm1013_vm6 = vmand %vm983_vm3, %vm1184_vm15  ;;  %v489_v30 = vpack.c.bf16 %v218_v20, %v185_v15  ;;  %v510_v33 = vpack.c.bf16 %v219_v23, %v186_v16  ;;  %vm1187_vm5 = vcmp.lt.s32.totalorder %v674_v21, 15  ;;  %vm1190_vm11 = vcmp.lt.s32.totalorder %v706_v31, 15 }
  0x99   :  { %vm511_vm4 = vmpackc.low %vm963_vm7, %vm994_vm9  ;;  %488 = vmatprep.subr.msk.bf16.mxu0 %vm487_vm0, %v486_v29  ;;  %vm1193_vm15 = vcmp.lt.s32.totalorder %v685_v26, 15  ;;  %v231_v21 = vpop.permute.xlu1 %230  ;;  %v229_v25 = vpop.permute.xlu0 %228  ;;  %vm252_vm0 = vcmask 588800  }
  0x9a   :  { %vm490_vm14 = vmpackc.low %vm971_vm10, %vm1005_vm8  ;;  %512 = vmatprep.subr.msk.bf16.mxu1 %vm511_vm4, %v510_v33  ;;  %vm232_vm8 = vcmp.lt.s32.totalorder %v666_v14, 111  ;;  %v245_v14 = vld [vmem:[%s1096_s1] sm:$0xff] }
  0x9b   :  { %vm514_vm1 = vmpackc.low %vm983_vm3, %vm1013_vm6  ;;  %491 = vmatpush1.bf16.msk.msra.mxu0 %vm490_vm14, %v489_v30  ;;  %v236_v31 = vsel %vm232_vm8, %v231_v21, %v225_v17  ;;  %v233_v37 = vsel %vm232_vm8, %v229_v25, %v231_v21  ;;  %v234_v38 = vsel %vm232_vm8, %v227_v34, %v229_v25  ;;  %v235_v39 = vsel %vm232_vm8, %v225_v17, %v227_v34 }
  0x9c   :  { %vm1049_vm9 = vmand %vm875_vm13, %vm1187_vm5  ;;  %515 = vmatpush1.bf16.msk.msra.mxu1 %vm514_vm1, %v513_v24  ;;  %vm1194_vm13 = vcmp.lt.s32.totalorder %v710_v32, 15 }
  0x9d   :  { %vm1062_vm12 = vmand %vm963_vm7, %vm1190_vm11  ;;  %444 = vmatprep.subr.msk.mxu0 %vm1049_vm9, %v234_v38 }
  0x9e   :  { %vm237_vm6 = vmand %vm971_vm10, %vm1193_vm15  ;;  %463 = vmatprep.subr.msk.mxu1 %vm1062_vm12, %v236_v31 }
  0x9f   :  { %vm239_vm2 = vmand %vm983_vm3, %vm1194_vm13  ;;  %445 = vmatpush1.msk.msra.mxu0 %vm237_vm6, %v235_v39 }
  0xa0   :  { %464 = vmatpush1.msk.msra.mxu1 %vm239_vm2, %v233_v37  ;;  %446 = vmatmul.mubr.msk.f32.vlgmr.msra.gmra.mrb[0].mxu0 %vm252_vm0, %v245_v14 }
  0xa1   :  { %465 = vmatmul.mubr.msk.f32.vlgmr.msra.gmra.mrb[0].mxu1 %vm252_vm0, %v245_v14 }
  0xaa   :  { %v250_v26 = vpop.permute.xlu0 %249 }
 0x173   :  { %v322_v32 = vpop.f32.mrb[0].mxu0 }
 0x174   :  { %v393_v40 = vpop.f32.mrb[0].mxu1  ;;  %v323_v41 = vadd.f32 %v322_v32, %v250_v26  ;;  %v324_v43 = vpop.f32.mrb[1].mxu0 }
 0x175   :  { %v394_v42 = vadd.f32 %v393_v40, %v250_v26  ;;  %v395_v44 = vpop.f32.mrb[1].mxu1  ;;  %v325_v45 = vadd.f32 %v324_v43, %v250_v26 }
 0x176   :  { %v396_v46 = vadd.f32 %v395_v44, %v250_v26  ;;  %v402_v47 = vmul.f32 0.70710677, %v323_v41  ;;  %v398_v53 = vmul.f32 0.5, %v323_v41 }
 0x177   :  { %v404_v48 = vmul.f32 0.70710677, %v394_v42  ;;  %v403_v49 = vmul.f32 0.70710677, %v325_v45  ;;  %v400_v56 = vmul.f32 0.5, %v394_v42  ;;  %v399_v60 = vmul.f32 0.5, %v325_v45 }
 0x178   :  { %v405_v50 = vmul.f32 0.70710677, %v396_v46  ;;  %599 = verf.f32 %v402_v47  ;;  %v401_v63 = vmul.f32 0.5, %v396_v46 }
 0x179   :  { %601 = verf.f32 %v404_v48 }
 0x17a   :  { %603 = verf.f32 %v403_v49 }
 0x17b   :  { %605 = verf.f32 %v405_v50 }
 0x182   :  { %v600_v51 = vpop.eup %599 }
 0x183   :  { %v602_v52 = vpop.eup %601  ;;  %v410_v54 = vadd.f32 1.0, %v600_v51 }
 0x184   :  { %v604_v55 = vpop.eup %603  ;;  %v412_v57 = vadd.f32 1.0, %v602_v52 }
 0x185   :  { %v606_v58 = vpop.eup %605  ;;  %v414_v59 = vmul.f32 %v410_v54, %v398_v53  ;;  %v411_v61 = vadd.f32 1.0, %v604_v55 }
 0x186   :  { %v416_v62 = vmul.f32 %v412_v57, %v400_v56  ;;  %v413_v0 = vadd.f32 1.0, %v606_v58 }
 0x187   :  { %418 = vst [vmem:[%s1097_s3] sm:$0xff] %v414_v59  ;;  %v415_v1 = vmul.f32 %v411_v61, %v399_v60 }
 0x188   :  { %466 = vst [vmem:[%s1097_s3 + $0x10] sm:$0xff] %v416_v62  ;;  %v417_v2 = vmul.f32 %v413_v0, %v401_v63 }
 0x189   :  { %419 = vst [vmem:[%s1097_s3 + $0x8] sm:$0xff] %v415_v1 }
 0x18a   :  { %467 = vst [vmem:[%s1097_s3 + $0x18] sm:$0xff] %v417_v2 }

</bundles_post_ra>
